<compile_context>
chip_gen: v6e
topology: v6e:2x2x1
jax: 0.10.0
libtpu: 0.0.40
codegen_flags: <defaults>
</compile_context>

<pallas_src>
import jax
import jax.numpy as jnp
from jax.experimental import pallas as pl
from jax.experimental.pallas import tpu as pltpu

CE_WEIGHT = 1.0
TRIPLET_WEIGHT = 0.1
TRIPLET_MARGIN = 0.2
SMOOTHING = 0.1
CONFIDENCE = 1.0 - SMOOTHING
# Static stand-in for the reference's `distances.max()` used to push same-label
# entries out of the hardest-negative min. Result is identical whenever each
# anchor has at least one negative in the batch (the only case in which the
# reference produces a non-trivial triplet term).
NEG_MASK_CONST = 1e9


def combined_loss_kernel(logits_ref, labels_col_ref, labels_row_ref,
                         emb_ref, sqn_col_ref, sqn_row_ref, out_ref):
    logits = logits_ref[...].astype(jnp.float32)        # (B, C)
    labels_col = labels_col_ref[...]                    # (B, 1) int32
    labels_row = labels_row_ref[...]                    # (1, B) int32

    B, C = logits.shape

    # ---------------- Label-smoothing cross entropy ----------------
    # No (B,C) logp temporary: logp[label] = shifted[label] - lse,
    # sum_c logp = sum_c shifted - C*lse.
    m = jnp.max(logits, axis=-1, keepdims=True)                         # (B, 1)
    shifted = logits - m                                                # (B, C)
    lse = jnp.log(jnp.sum(jnp.exp(shifted), axis=-1, keepdims=True))    # (B, 1)

    class_iota = jax.lax.broadcasted_iota(jnp.int32, (B, C), 1)
    shifted_at_label = jnp.sum(
        jnp.where(class_iota == labels_col, shifted, 0.0),
        axis=-1, keepdims=True)                                         # (B, 1)
    sum_shifted = jnp.sum(shifted, axis=-1, keepdims=True)              # (B, 1)

    logp_at_label = shifted_at_label - lse                              # (B, 1)
    sum_logp = sum_shifted - C * lse                                    # (B, 1)

    smooth_val = SMOOTHING / (C - 1)
    # sum_c -true_dist*logp = -((confidence - smooth)*logp[label] + smooth*sum_c logp)
    ce_per_row = -((CONFIDENCE - smooth_val) * logp_at_label + smooth_val * sum_logp)
    ce_loss = jnp.sum(ce_per_row, axis=0, keepdims=True) * (1.0 / B)    # (1, 1)

    # ---------------- Triplet loss (batch hard, squared-distance mining) ----------
    emb = emb_ref[...]                                   # (B, D), native dtype to MXU
    dot = jax.lax.dot_general(
        emb, emb, (((1,), (1,)), ((), ())),
        preferred_element_type=jnp.float32)              # (B, B) Gram matrix, f32 acc

    sq_col = sqn_col_ref[...]                            # (B, 1) ||e_i||^2 (precomputed)
    sq_row = sqn_row_ref[...]                            # (1, B) ||e_j||^2 (precomputed)
    dist2 = jnp.maximum(sq_row - 2.0 * dot + sq_col, 0.0)   # (B, B) squared distances

    labels_eq = labels_col == labels_row                     # (B, B) bool
    row_iota = jax.lax.broadcasted_iota(jnp.int32, (B, B), 0)
    col_iota = jax.lax.broadcasted_iota(jnp.int32, (B, B), 1)
    # Exclude the diagonal from positives (reference includes it at exact-zero dist;
    # fp rounding here could otherwise make it a tiny positive).
    pos_mask = jnp.logical_and(labels_eq, row_iota != col_iota)

    # Mine in squared space (sqrt is monotone on non-negatives), sqrt only 2 x (B,1).
    hardest_pos2 = jnp.max(jnp.where(pos_mask, dist2, 0.0), axis=1, keepdims=True)
    hardest_neg2 = jnp.min(jnp.where(labels_eq, NEG_MASK_CONST, dist2),
                           axis=1, keepdims=True)
    hardest_pos = jnp.sqrt(hardest_pos2)                                 # (B, 1)
    hardest_neg = jnp.sqrt(hardest_neg2)                                 # (B, 1)

    triplet = jnp.maximum(hardest_pos - hardest_neg + TRIPLET_MARGIN, 0.0)   # (B, 1)
    valid = (triplet > 1e-16).astype(jnp.float32)
    num_pos = jnp.sum(valid, axis=0, keepdims=True)                      # (1, 1)
    trip_sum = jnp.sum(triplet, axis=0, keepdims=True)                   # (1, 1)
    inv_np = pl.reciprocal(num_pos + 1e-16, approx=True)                 # EUP slot
    triplet_loss = jnp.where(num_pos == 0.0, 0.0, trip_sum * inv_np)     # (1, 1)

    total = CE_WEIGHT * ce_loss + TRIPLET_WEIGHT * triplet_loss          # (1, 1)
    out_ref[...] = total.astype(jnp.float32)


def combined_loss(logits, labels, embeddings):
    B, C = logits.shape
    _, D = embeddings.shape
    assert C > 1, "label smoothing requires at least 2 classes (smoothing/(C-1))"

    labels_i32 = labels.astype(jnp.int32)
    labels_col = labels_i32.reshape(B, 1)
    labels_row = labels_i32.reshape(1, B)

    # Precomputed squared norms (B floats): removes the degenerate (1,D) matmul and
    # the in-kernel (B,D) elementwise-square pass.
    sq = jnp.sum(embeddings.astype(jnp.float32) ** 2, axis=1)
    sq_col = sq.reshape(B, 1)
    sq_row = sq.reshape(1, B)

    out = pl.pallas_call(
        combined_loss_kernel,
        out_shape=jax.ShapeDtypeStruct((1, 1), jnp.float32),
        grid=(1,),
        in_specs=[
            pl.BlockSpec((B, C), lambda i: (0, 0)),
            pl.BlockSpec((B, 1), lambda i: (0, 0)),
            pl.BlockSpec((1, B), lambda i: (0, 0)),
            pl.BlockSpec((B, D), lambda i: (0, 0)),
            pl.BlockSpec((B, 1), lambda i: (0, 0)),
            pl.BlockSpec((1, B), lambda i: (0, 0)),
        ],
        out_specs=pl.BlockSpec((1, 1), lambda i: (0, 0)),
        compiler_params=pltpu.CompilerParams(
            dimension_semantics=("arbitrary",)),
    )(logits, labels_col, labels_row, embeddings, sq_col, sq_row)
    return out[0, 0]


if __name__ == "__main__":
    key = jax.random.PRNGKey(0)
    k1, k2, k3 = jax.random.split(key, 3)

    B, C, D = 8, 2, 32   # batch=8, binary OSV classes, embedding dim=32
    logits = jax.random.normal(k1, (B, C), dtype=jnp.float32)
    labels = jax.random.randint(k2, (B,), 0, C, dtype=jnp.int32)
    embeddings = jax.random.normal(k3, (B, D), dtype=jnp.float32)

    total = combined_loss(logits, labels, embeddings)
    jax.block_until_ready(total)
    print("KERNEL_OK")
</pallas_src>

<mosaic_0001>
module attributes {stable_mosaic.version = 11 : i64} {
  func.func @combined_loss_kernel(%arg0: i32, %arg1: memref<8x2xf32, #tpu.memory_space<vmem>>, %arg2: memref<8x1xi32, #tpu.memory_space<vmem>>, %arg3: memref<1x8xi32, #tpu.memory_space<vmem>>, %arg4: memref<8x32xf32, #tpu.memory_space<vmem>>, %arg5: memref<8x1xf32, #tpu.memory_space<vmem>>, %arg6: memref<1x8xf32, #tpu.memory_space<vmem>>, %arg7: memref<1x1xf32, #tpu.memory_space<vmem>>) attributes {dimension_semantics = [#tpu.dimension_semantics<arbitrary>], iteration_bounds = array<i64: 1>, scalar_prefetch = 0 : i64, scratch_operands = 0 : i64, tpu.core_type = #tpu.core_type<tc>, window_params = [{pipeline_mode = #tpu.pipeline_mode<synchronous>, transform_indices = @transform_0, window_bounds = array<i64: 8, 2>}, {pipeline_mode = #tpu.pipeline_mode<synchronous>, transform_indices = @transform_1, window_bounds = array<i64: 8, 1>}, {pipeline_mode = #tpu.pipeline_mode<synchronous>, transform_indices = @transform_2, window_bounds = array<i64: 1, 8>}, {pipeline_mode = #tpu.pipeline_mode<synchronous>, transform_indices = @transform_3, window_bounds = array<i64: 8, 32>}, {pipeline_mode = #tpu.pipeline_mode<synchronous>, transform_indices = @transform_4, window_bounds = array<i64: 8, 1>}, {pipeline_mode = #tpu.pipeline_mode<synchronous>, transform_indices = @transform_5, window_bounds = array<i64: 1, 8>}, {pipeline_mode = #tpu.pipeline_mode<synchronous>, transform_indices = @transform_6, window_bounds = array<i64: 1, 1>}]} {
    %c0 = arith.constant 0 : index
    %c0_0 = arith.constant 0 : index
    %0 = vector.load %arg1[%c0, %c0_0] : memref<8x2xf32, #tpu.memory_space<vmem>>, vector<8x2xf32>
    %c0_1 = arith.constant 0 : index
    %c0_2 = arith.constant 0 : index
    %1 = vector.load %arg2[%c0_1, %c0_2] : memref<8x1xi32, #tpu.memory_space<vmem>>, vector<8x1xi32>
    %c0_3 = arith.constant 0 : index
    %c0_4 = arith.constant 0 : index
    %2 = vector.load %arg3[%c0_3, %c0_4] : memref<1x8xi32, #tpu.memory_space<vmem>>, vector<1x8xi32>
    %cst = arith.constant dense<0xFF800000> : vector<8xf32>
    %3 = vector.multi_reduction <maximumf>, %0, %cst [1] : vector<8x2xf32> to vector<8xf32>
    %4 = vector.shape_cast %3 : vector<8xf32> to vector<8x1xf32>
    %5 = vector.broadcast %4 : vector<8x1xf32> to vector<8x2xf32>
    %6 = arith.subf %0, %5 : vector<8x2xf32>
    %7 = math.exp %6 : vector<8x2xf32>
    %cst_5 = arith.constant dense<0.000000e+00> : vector<8xf32>
    %8 = vector.multi_reduction <add>, %7, %cst_5 [1] : vector<8x2xf32> to vector<8xf32>
    %9 = vector.shape_cast %8 : vector<8xf32> to vector<8x1xf32>
    %10 = math.log %9 : vector<8x1xf32>
    %11 = tpu.iota {dimensions = array<i32: 1>} : vector<8x2xi32>
    %12 = vector.broadcast %1 : vector<8x1xi32> to vector<8x2xi32>
    %13 = arith.cmpi eq, %11, %12 : vector<8x2xi32>
    %cst_6 = arith.constant 0.000000e+00 : f32
    %14 = vector.broadcast %cst_6 : f32 to vector<8x2xf32>
    %15 = arith.select %13, %6, %14 : vector<8x2xi1>, vector<8x2xf32>
    %cst_7 = arith.constant dense<0.000000e+00> : vector<8xf32>
    %16 = vector.multi_reduction <add>, %15, %cst_7 [1] : vector<8x2xf32> to vector<8xf32>
    %17 = vector.shape_cast %16 : vector<8xf32> to vector<8x1xf32>
    %cst_8 = arith.constant dense<0.000000e+00> : vector<8xf32>
    %18 = vector.multi_reduction <add>, %6, %cst_8 [1] : vector<8x2xf32> to vector<8xf32>
    %19 = vector.shape_cast %18 : vector<8xf32> to vector<8x1xf32>
    %20 = arith.subf %17, %10 : vector<8x1xf32>
    %cst_9 = arith.constant 2.000000e+00 : f32
    %21 = vector.broadcast %cst_9 : f32 to vector<8x1xf32>
    %22 = arith.mulf %21, %10 : vector<8x1xf32>
    %23 = arith.subf %19, %22 : vector<8x1xf32>
    %cst_10 = arith.constant 8.000000e-01 : f32
    %24 = vector.broadcast %cst_10 : f32 to vector<8x1xf32>
    %25 = arith.mulf %24, %20 : vector<8x1xf32>
    %cst_11 = arith.constant 1.000000e-01 : f32
    %26 = vector.broadcast %cst_11 : f32 to vector<8x1xf32>
    %27 = arith.mulf %26, %23 : vector<8x1xf32>
    %28 = arith.addf %25, %27 : vector<8x1xf32>
    %cst_12 = arith.constant 0.000000e+00 : f32
    %29 = vector.broadcast %cst_12 : f32 to vector<8x1xf32>
    %30 = arith.subf %29, %28 : vector<8x1xf32>
    %cst_13 = arith.constant dense<0.000000e+00> : vector<1xf32>
    %31 = vector.multi_reduction <add>, %30, %cst_13 [0] : vector<8x1xf32> to vector<1xf32>
    %32 = vector.shape_cast %31 : vector<1xf32> to vector<1x1xf32>
    %cst_14 = arith.constant 1.250000e-01 : f32
    %33 = vector.broadcast %cst_14 : f32 to vector<1x1xf32>
    %34 = arith.mulf %32, %33 : vector<1x1xf32>
    %c0_15 = arith.constant 0 : index
    %c0_16 = arith.constant 0 : index
    %35 = vector.load %arg4[%c0_15, %c0_16] : memref<8x32xf32, #tpu.memory_space<vmem>>, vector<8x32xf32>
    %cst_17 = arith.constant dense<0.000000e+00> : vector<8x8xf32>
    %36 = tpu.matmul %35, %35, %cst_17 {dimension_numbers = #tpu.dot_dimension_numbers<[1], [1], [0], [0], [0, 0, 1, 0], [], []>} : vector<8x32xf32>, vector<8x32xf32>, vector<8x8xf32> -> vector<8x8xf32>
    %c0_18 = arith.constant 0 : index
    %c0_19 = arith.constant 0 : index
    %37 = vector.load %arg5[%c0_18, %c0_19] : memref<8x1xf32, #tpu.memory_space<vmem>>, vector<8x1xf32>
    %c0_20 = arith.constant 0 : index
    %c0_21 = arith.constant 0 : index
    %38 = vector.load %arg6[%c0_20, %c0_21] : memref<1x8xf32, #tpu.memory_space<vmem>>, vector<1x8xf32>
    %cst_22 = arith.constant 2.000000e+00 : f32
    %39 = vector.broadcast %cst_22 : f32 to vector<8x8xf32>
    %40 = arith.mulf %39, %36 : vector<8x8xf32>
    %41 = vector.broadcast %38 : vector<1x8xf32> to vector<8x8xf32>
    %42 = arith.subf %41, %40 : vector<8x8xf32>
    %43 = vector.broadcast %37 : vector<8x1xf32> to vector<8x8xf32>
    %44 = arith.addf %42, %43 : vector<8x8xf32>
    %cst_23 = arith.constant 0.000000e+00 : f32
    %45 = vector.broadcast %cst_23 : f32 to vector<8x8xf32>
    %46 = arith.maximumf %44, %45 : vector<8x8xf32>
    %47 = vector.broadcast %1 : vector<8x1xi32> to vector<8x8xi32>
    %48 = vector.broadcast %2 : vector<1x8xi32> to vector<8x8xi32>
    %49 = arith.cmpi eq, %47, %48 : vector<8x8xi32>
    %50 = tpu.iota {dimensions = array<i32: 0>} : vector<8x8xi32>
    %51 = tpu.iota {dimensions = array<i32: 1>} : vector<8x8xi32>
    %52 = arith.cmpi ne, %50, %51 : vector<8x8xi32>
    %53 = arith.andi %49, %52 : vector<8x8xi1>
    %cst_24 = arith.constant 0.000000e+00 : f32
    %54 = vector.broadcast %cst_24 : f32 to vector<8x8xf32>
    %55 = arith.select %53, %46, %54 : vector<8x8xi1>, vector<8x8xf32>
    %cst_25 = arith.constant dense<0xFF800000> : vector<8xf32>
    %56 = vector.multi_reduction <maximumf>, %55, %cst_25 [1] : vector<8x8xf32> to vector<8xf32>
    %57 = vector.shape_cast %56 : vector<8xf32> to vector<8x1xf32>
    %cst_26 = arith.constant 1.000000e+09 : f32
    %58 = vector.broadcast %cst_26 : f32 to vector<8x8xf32>
    %59 = arith.select %49, %58, %46 : vector<8x8xi1>, vector<8x8xf32>
    %cst_27 = arith.constant dense<0x7F800000> : vector<8xf32>
    %60 = vector.multi_reduction <minimumf>, %59, %cst_27 [1] : vector<8x8xf32> to vector<8xf32>
    %61 = vector.shape_cast %60 : vector<8xf32> to vector<8x1xf32>
    %62 = math.sqrt %57 : vector<8x1xf32>
    %63 = math.sqrt %61 : vector<8x1xf32>
    %64 = arith.subf %62, %63 : vector<8x1xf32>
    %cst_28 = arith.constant 2.000000e-01 : f32
    %65 = vector.broadcast %cst_28 : f32 to vector<8x1xf32>
    %66 = arith.addf %64, %65 : vector<8x1xf32>
    %cst_29 = arith.constant 0.000000e+00 : f32
    %67 = vector.broadcast %cst_29 : f32 to vector<8x1xf32>
    %68 = arith.maximumf %66, %67 : vector<8x1xf32>
    %cst_30 = arith.constant 1.000000e-16 : f32
    %69 = vector.broadcast %cst_30 : f32 to vector<8x1xf32>
    %70 = arith.cmpf ogt, %68, %69 : vector<8x1xf32>
    %71 = arith.extui %70 : vector<8x1xi1> to vector<8x1xi32>
    %72 = arith.sitofp %71 : vector<8x1xi32> to vector<8x1xf32>
    %cst_31 = arith.constant dense<0.000000e+00> : vector<1xf32>
    %73 = vector.multi_reduction <add>, %72, %cst_31 [0] : vector<8x1xf32> to vector<1xf32>
    %74 = vector.shape_cast %73 : vector<1xf32> to vector<1x1xf32>
    %cst_32 = arith.constant dense<0.000000e+00> : vector<1xf32>
    %75 = vector.multi_reduction <add>, %68, %cst_32 [0] : vector<8x1xf32> to vector<1xf32>
    %76 = vector.shape_cast %75 : vector<1xf32> to vector<1x1xf32>
    %cst_33 = arith.constant 1.000000e-16 : f32
    %77 = vector.broadcast %cst_33 : f32 to vector<1x1xf32>
    %78 = arith.addf %74, %77 : vector<1x1xf32>
    %79 = tpu.reciprocal %78 {approx = true} : vector<1x1xf32> -> vector<1x1xf32>
    %cst_34 = arith.constant 0.000000e+00 : f32
    %80 = vector.broadcast %cst_34 : f32 to vector<1x1xf32>
    %81 = arith.cmpf oeq, %74, %80 : vector<1x1xf32>
    %82 = arith.mulf %76, %79 : vector<1x1xf32>
    %cst_35 = arith.constant 0.000000e+00 : f32
    %83 = vector.broadcast %cst_35 : f32 to vector<1x1xf32>
    %84 = arith.select %81, %83, %82 : vector<1x1xi1>, vector<1x1xf32>
    %cst_36 = arith.constant 1.000000e+00 : f32
    %85 = vector.broadcast %cst_36 : f32 to vector<1x1xf32>
    %86 = arith.mulf %85, %34 : vector<1x1xf32>
    %cst_37 = arith.constant 1.000000e-01 : f32
    %87 = vector.broadcast %cst_37 : f32 to vector<1x1xf32>
    %88 = arith.mulf %87, %84 : vector<1x1xf32>
    %89 = arith.addf %86, %88 : vector<1x1xf32>
    %c0_38 = arith.constant 0 : index
    %c0_39 = arith.constant 0 : index
    %90 = vector.load %arg7[%c0_38, %c0_39] : memref<1x1xf32, #tpu.memory_space<vmem>>, vector<1x1xf32>
    tpu.vector_store %arg7[%c0_38, %c0_39], %89 {strides = array<i32>} : memref<1x1xf32, #tpu.memory_space<vmem>>, vector<1x1xf32>,
    return
  }
  func.func @transform_0(%arg0: i32) -> (i32, i32) {
    %c0_i32 = arith.constant 0 : i32
    %c0_i32_0 = arith.constant 0 : i32
    %c0_i32_1 = arith.constant 0 : i32
    return %c0_i32, %c0_i32_0 : i32, i32
  }
  func.func @transform_1(%arg0: i32) -> (i32, i32) {
    %c0_i32 = arith.constant 0 : i32
    %c0_i32_0 = arith.constant 0 : i32
    %c0_i32_1 = arith.constant 0 : i32
    return %c0_i32, %c0_i32_0 : i32, i32
  }
  func.func @transform_2(%arg0: i32) -> (i32, i32) {
    %c0_i32 = arith.constant 0 : i32
    %c0_i32_0 = arith.constant 0 : i32
    %c0_i32_1 = arith.constant 0 : i32
    return %c0_i32, %c0_i32_0 : i32, i32
  }
  func.func @transform_3(%arg0: i32) -> (i32, i32) {
    %c0_i32 = arith.constant 0 : i32
    %c0_i32_0 = arith.constant 0 : i32
    %c0_i32_1 = arith.constant 0 : i32
    return %c0_i32, %c0_i32_0 : i32, i32
  }
  func.func @transform_4(%arg0: i32) -> (i32, i32) {
    %c0_i32 = arith.constant 0 : i32
    %c0_i32_0 = arith.constant 0 : i32
    %c0_i32_1 = arith.constant 0 : i32
    return %c0_i32, %c0_i32_0 : i32, i32
  }
  func.func @transform_5(%arg0: i32) -> (i32, i32) {
    %c0_i32 = arith.constant 0 : i32
    %c0_i32_0 = arith.constant 0 : i32
    %c0_i32_1 = arith.constant 0 : i32
    return %c0_i32, %c0_i32_0 : i32, i32
  }
  func.func @transform_6(%arg0: i32) -> (i32, i32) {
    %c0_i32 = arith.constant 0 : i32
    %c0_i32_0 = arith.constant 0 : i32
    %c0_i32_1 = arith.constant 0 : i32
    return %c0_i32, %c0_i32_0 : i32, i32
  }
}

</mosaic_0001>

<bundles_post_ra>
// kernel: tpu_custom_call.1
= control target key start
LH: loop header
LB: loop body
LE: loop exit
PB: predicated region body
PF: predicated region fallthrough
CT: control target
= control target key end

     0   :  { %vm67_vm0 = vcmask 261120   ;;  %vm27_vm1 = vcmask 15360   ;;  %v281_v2 = vmov 0.0   ;;  %vm282_vm2 = vmmov 0   ;;  %s351_s0 = inlined_call_operand.vmem [shape: f32[8,2], index: 0, kind: input, shape index: {}]   ;;  %s352_s1 = inlined_call_operand.vmem [shape: s32[8,1], index: 1, kind: input, shape index: {}]   ;;  %s353_s2 = inlined_call_operand.vmem [shape: s32[1,8], index: 2, kind: input, shape index: {}]   ;;  %s354_s3 = inlined_call_operand.vmem [shape: f32[8,32], index: 3, kind: input, shape index: {}]   ;;  %s355_s4 = inlined_call_operand.vmem [shape: f32[8,1], index: 4, kind: input, shape index: {}]   ;;  %s356_s5 = inlined_call_operand.vmem [shape: f32[1,8], index: 5, kind: input, shape index: {}]   ;;  %s357_s6 = inlined_call_operand.hbm [shape: f32[1,1], index: 6, kind: output, shape index: {}]  }
   0x1   :  { %v66_v0 = vld [vmem:[%s354_s3] sm:$0xff]  ;;  %238 = vmatprep.subr.mxu0 %v281_v2  ;;  %240 = vmatprep.mubr.msk.f32.mxu0 %vm282_vm2, %v281_v2 }
   0x2   :  { %v24_v1 = vld [vmem:[%s351_s0] sm:$0xff] }
   0x3   :  { %v28_v3 = vsel %vm27_vm1, %v24_v1, -inf  ;;  %v25_v4 = vld [vmem:[%s352_s1] sm:$0xff] }
   0x4   :  { %11 = vsyncpa [#allocation3], 0  ;;  %239 = vmatpush3.xpose.msk.msra.mxu0 %vm67_vm0, %v66_v0  ;;  %29 = vmax.xlane.f32.xlu0 %v28_v3  ;;  %v283_v5 = vmov 0   ;;  %v141_v6 = vld [vmem:[%s355_s4] sm:$0xff]  ;;  %v39_v7 = vlaneseq  ;;  %vm168_vm7 = vcmask 64512   ;;  %vm215_vm14 = vcmask 0  }
   0x5   :  { %248 = vset.pattern.permute.xlu1 %v283_v5  ;;  %247 = vset.pattern.permute.xlu0 %v283_v5  ;;  %v234_v16 = vld [vmem:[%s353_s2] ss:$0 sm:$0xff]  ;;  %s284_s2 = smov [#allocation2]  }
   0x6   :  { %42 = vperm.xlu1 %248, %v25_v4   ;;  %v40_v8 = vand.u32 127, %v39_v7  ;;  %v164_v9 = vshrl.u32 %v39_v7, 7  ;;  %v233_v18 = vld [vmem:[%s356_s5] ss:$0 sm:$0xff]  ;;  %s223_s5 = sshll.u32 %s284_s2, 4  ;;  %s224_s5 = int_to_ptr.vmem [resolvable:$true] %s223_s5 }
   0x7   :  { %241 = vmatmul.mubr.msk.f32.vlgmr.msra.gmra.mxu0 %vm67_vm0, %v66_v0  ;;  %s259_s29 = scalar_lea.vmem %s224_s5, 16  ;;  %s263_s30 = scalar_lea.vmem %s224_s5, 32 }
   0x8   :  { %vm165_vm3 = vcmp.ne.s32.totalorder %v164_v9, %v40_v8  ;;  %p260_p0 = scmp.ne.s32.totalorder %s224_s5, %s259_s29  ;;  %p264_p1 = scmp.lt.s32.totalorder %s224_s5, %s224_s5 }
   0x9   :  { %p265_p2 = scmp.lt.s32.totalorder %s263_s30, %s259_s29 }
   0xb   :  { %p266_p3 = por %p265_p2, %p264_p1 }
   0xd   :  { %p267_p4 = pnand %p266_p3, %p260_p0 }
  0x1a   :  { %153 = vperm.xlu0 %247, %v141_v6  }
  0x81   :  { %v43_v10 = vpop.permute.xlu1 %42 }
  0x82   :  { %vm44_vm4 = vcmp.eq.s32.totalorder %v40_v8, %v43_v10  ;;  %vm162_vm5 = vcmp.eq.s32.totalorder %v43_v10, %v234_v16 }
  0x83   :  { %vm166_vm6 = vmand %vm162_vm5, %vm165_vm3 }
  0x8d   :  { %v30_v11 = vpop.xlane.xlu0 %29 }
  0x8e   :  { %v31_v12 = vsub.f32 %v24_v1, %v30_v11 }
  0x90   :  { %v45_v13 = vsel %vm44_vm4, %v31_v12, 0.0  ;;  %v32_v15 = vmul.f32 1.442695, %v31_v12  ;;  %v49_v31 = vsel %vm27_vm1, %v31_v12, 0.0 }
  0x91   :  { %v46_v14 = vsel %vm27_vm1, %v45_v13, 0.0 }
  0x92   :  { %47 = vadd.xlane.f32.xlu0 %v46_v14  ;;  %249 = vpow2.f32 %v32_v15 }
  0x95   :  { %v154_v21 = vpop.permute.xlu0 %153 }
  0x9f   :  { %v250_v29 = vpop.eup %249 }
  0xa0   :  { %v34_v30 = vsel %vm27_vm1, %v250_v29, 0.0 }
  0xc7   :  { %v137_v17 = vpop.f32.mrf.mxu0 }
  0xc8   :  { %v143_v19 = vmul.f32 2.0, %v137_v17 }
  0xc9   :  { %v242_v20 = vpop.f32.mrf.mxu0 }
  0xca   :  { %v150_v22 = vsub.f32 %v233_v18, %v143_v19 }
  0xcc   :  { %v156_v23 = vadd.f32 %v154_v21, %v150_v22 }
  0xce   :  { %v157_v24 = vmax.f32 %v156_v23, 0.0 }
  0xd0   :  { %v167_v25 = vsel %vm166_vm6, %v157_v24, 0.0  ;;  %v172_v27 = vsel %vm162_vm5, 1e+09, %v157_v24 }
  0xd1   :  { %v169_v26 = vsel %vm168_vm7, %v167_v25, -inf  ;;  %v173_v28 = vsel %vm168_vm7, %v172_v27, inf }
  0xd2   :  { %170 = vmax.xlane.f32.xlu1 %v169_v26 }
  0xd6   :  { %174 = vmin.xlane.f32.xlu1 %v173_v28 }
  0xda   :  { %35 = vadd.xlane.f32.xlu1 %v34_v30 }
  0xde   :  { %50 = vadd.xlane.f32.xlu1 %v49_v31 }
 0x11b   :  { %v48_v48 = vpop.xlane.xlu0 %47 }
 0x15b   :  { %v171_v32 = vpop.xlane.xlu1 %170 }
 0x15c   :  { %251 = vrsqrt.f32 %v171_v32  ;;  %vm178_vm8 = vcmp.eq.f32.partialorder %v171_v32, inf  ;;  %v181_v40 = vand.u32 2147483648, %v171_v32  ;;  %vm180_vm10 = vcmp.eq.f32.partialorder %v171_v32, 0.0 }
 0x15f   :  { %v175_v33 = vpop.xlane.xlu1 %174 }
 0x160   :  { %253 = vrsqrt.f32 %v175_v33  ;;  %vm185_vm9 = vcmp.eq.f32.partialorder %v175_v33, inf  ;;  %v188_v41 = vand.u32 2147483648, %v175_v33  ;;  %vm187_vm11 = vcmp.eq.f32.partialorder %v175_v33, 0.0 }
 0x163   :  { %v36_v34 = vpop.xlane.xlu1 %35 }
 0x164   :  { %255 = vlog2.f32 %v36_v34 }
 0x167   :  { %v51_v52 = vpop.xlane.xlu1 %50 }
 0x169   :  { %v252_v35 = vpop.eup %251 }
 0x16a   :  { %v177_v36 = vmul.f32 %v252_v35, %v171_v32 }
 0x16c   :  { %v179_v38 = vsel %vm178_vm8, %v171_v32, %v177_v36 }
 0x16d   :  { %v254_v37 = vpop.eup %253  ;;  %v182_v44 = vsel %vm180_vm10, %v181_v40, %v179_v38 }
 0x16e   :  { %v184_v39 = vmul.f32 %v254_v37, %v175_v33 }
 0x170   :  { %v186_v42 = vsel %vm185_vm9, %v175_v33, %v184_v39 }
 0x171   :  { %v256_v43 = vpop.eup %255  ;;  %v189_v45 = vsel %vm187_vm11, %v188_v41, %v186_v42 }
 0x172   :  { %v190_v46 = vsub.f32 %v182_v44, %v189_v45  ;;  %v38_v47 = vmul.f32 0.6931472, %v256_v43 }
 0x174   :  { %v191_v49 = vadd.f32 0.2, %v190_v46  ;;  %v53_v50 = vmul.f32 2.0, %v38_v47  ;;  %v52_v51 = vsub.f32 %v48_v48, %v38_v47 }
 0x176   :  { %v192_v53 = vmax.f32 %v191_v49, 0.0  ;;  %v54_v54 = vsub.f32 %v51_v52, %v53_v50  ;;  %v55_v55 = vmul.f32 0.8, %v52_v51 }
 0x178   :  { %v56_v56 = vmul.f32 0.1, %v54_v54  ;;  %vm193_vm12 = vcmp.gt.f32.partialorder %v192_v53, 1e-16  ;;  %v202_v0 = vrot.slane %v192_v53, 4 }
 0x179   :  { %v235_v57 = vsel %vm193_vm12, 1.0, %v281_v2 }
 0x17a   :  { %v57_v58 = vadd.f32 %v56_v56, %v55_v55  ;;  %v196_v59 = vrot.slane %v235_v57, 4  ;;  %v203_v5 = vadd.f32 %v202_v0, %v192_v53 }
 0x17c   :  { %v197_v60 = vadd.f32 %v235_v57, %v196_v59  ;;  %v58_v61 = vsub.f32 0.0, %v57_v58  ;;  %v204_v8 = vrot.slane %v203_v5, 2 }
 0x17e   :  { %v198_v62 = vrot.slane %v197_v60, 2  ;;  %v59_v1 = vrot.slane %v58_v61, 4  ;;  %v205_v10 = vadd.f32 %v204_v8, %v203_v5 }
 0x180   :  { %v199_v63 = vadd.f32 %v198_v62, %v197_v60  ;;  %v60_v6 = vadd.f32 %v59_v1, %v58_v61  ;;  %v206_v12 = vrot.slane %v205_v10, 1 }
 0x182   :  { %v200_v3 = vrot.slane %v199_v63, 1  ;;  %v61_v9 = vrot.slane %v60_v6, 2  ;;  %v207_v13 = vadd.f32 %v206_v12, %v205_v10 }
 0x184   :  { %v201_v4 = vadd.f32 %v200_v3, %v199_v63  ;;  %v62_v11 = vadd.f32 %v61_v9, %v60_v6 }
 0x186   :  { %v208_v7 = vadd.f32 1e-16, %v201_v4  ;;  %v63_v2 = vrot.slane %v62_v11, 1  ;;  %vm210_vm13 = vcmp.eq.f32.partialorder %v201_v4, 0.0 }
 0x188   :  { %257 = vrcp.f32 %v208_v7  ;;  %v64_v15 = vadd.f32 %v63_v2, %v62_v11 }
 0x18a   :  { %v65_v18 = vmul.f32 0.125, %v64_v15 }
 0x195   :  { %v258_v14 = vpop.eup %257 }
 0x196   :  { %v211_v16 = vmul.f32 %v258_v14, %v207_v13 }
 0x198   :  { %v212_v17 = vsel %vm210_vm13, 0.0, %v211_v16 }
 0x199   :  { %v213_v19 = vmul.f32 0.1, %v212_v17 }
 0x19b   :  { %v214_v20 = vadd.f32 %v213_v19, %v65_v18 }
 0x19d   :  { %216 = vst.msk [vmem:[#allocation2] sm:$0x1] %vm215_vm14, %v214_v20 }
 0x19e   :  { %270 = shalt.err (!%p267_p4)
}
 0x19f   :  { %226 = dma.vmem_to_hbm [thread:$0]  %s224_s5, 16, %s357_s6, [#allocation3]  }
 0x1a0   :  { %279 = dma.done.wait [#allocation3], 16  }
 0x1a1   :  { %280 = vsyncadd [#allocation3], 4294967280 }
 0x1a2   :  { %230 = vsyncpa [#allocation3], 1 }

</bundles_post_ra>
